<compile_context>
chip_gen: v7x
topology: tpu7x:2x2x1
jax: 0.10.0
libtpu: 0.0.40
codegen_flags: <defaults>
</compile_context>

<pallas_src>
import numpy as np
from functools import partial

import jax
import jax.numpy as jnp
from jax.experimental import pallas as pl
from jax.experimental.pallas import tpu as pltpu


def _ru(x, m):
    return (x + m - 1) // m * m


# ----------------------------------------------------------------------------
# Fused matmul (MXU) kernel: C = epilogue(A @ B + bias, alpha)
# ----------------------------------------------------------------------------
def _leaky(y):
    return jnp.where(y > 0, y, 0.01 * y)


_EPILOGUES = {
    'none':       lambda acc, b, a: acc,
    'bias':       lambda acc, b, a: acc + b,
    'bias_leaky': lambda acc, b, a: _leaky(acc + b),
    'prelu':      lambda acc, b, a: jnp.where(acc > 0, acc, a * acc),
    'relu':       lambda acc, b, a: jnp.maximum(acc, 0.0),
    'sigmoid':    lambda acc, b, a: 1.0 / (1.0 + jnp.exp(-acc)),
}


def _make_mm_kernel(name):
    epi = _EPILOGUES[name]

    def kernel(a_ref, b_ref, r0_ref, r1_ref, o_ref, acc_ref):
        @pl.when(pl.program_id(2) == 0)
        def _init():
            acc_ref[...] = jnp.zeros_like(acc_ref)

        acc_ref[...] += jnp.dot(a_ref[...], b_ref[...],
                                preferred_element_type=jnp.float32)

        @pl.when(pl.program_id(2) == pl.num_programs(2) - 1)
        def _finish():
            o_ref[...] = epi(acc_ref[...], r0_ref[0:1, :],
                             r1_ref[0:1, :]).astype(o_ref.dtype)

    return kernel


_MM_KERNELS = {k: _make_mm_kernel(k) for k in _EPILOGUES}


@partial(jax.jit, static_argnames=('epilogue', 'out_dtype'))
def _matmul_impl(a, b, bias, alpha, *, epilogue, out_dtype):
    M, K = a.shape
    K2, N = b.shape
    if K != K2:
        raise ValueError('matmul shape mismatch')
    a = a.astype(jnp.bfloat16)
    b = b.astype(jnp.bfloat16)

    # ---- K alignment / K tile (adaptive, minimal padding) ----
    Kp = _ru(K, 8) if K <= 128 else _ru(K, 128)
    if Kp != K:
        a = jnp.pad(a, ((0, 0), (0, Kp - K)))
        b = jnp.pad(b, ((0, Kp - K), (0, 0)))
    if Kp <= 1024:
        TK = Kp
    else:
        nk = Kp // 128
        d = next(dd for dd in (4, 3, 2, 1) if nk % dd == 0)
        TK = 128 * d

    # ---- N tile: full N (<=512) as a single lane-dense tile ----
    if N <= 512:
        Np = N if (N <= 128 or N % 128 == 0) else _ru(N, 128)
        TN = Np
    else:
        Np = _ru(N, 512)
        TN = 512
    if Np != N:
        b = jnp.pad(b, ((0, 0), (0, Np - N)))

    # ---- M tile ----
    if M >= 512:
        TM = 512
    elif M >= 256:
        TM = 256
    else:
        TM = _ru(M, 8)
    Mp = _ru(M, TM)
    if Mp != M:
        a = jnp.pad(a, ((0, Mp - M), (0, 0)))

    # ---- per-channel epilogue rows (bias / prelu alpha) ----
    bvec = (jnp.zeros((N,), jnp.float32) if bias is None
            else bias.astype(jnp.float32).reshape(N))
    avec = (jnp.zeros((N,), jnp.float32) if alpha is None
            else alpha.astype(jnp.float32).reshape(N))
    r0 = jnp.tile(bvec.reshape(1, N), (8, 1))
    r1 = jnp.tile(avec.reshape(1, N), (8, 1))
    if Np != N:
        r0 = jnp.pad(r0, ((0, 0), (0, Np - N)))
        r1 = jnp.pad(r1, ((0, 0), (0, Np - N)))

    grid = (Mp // TM, Np // TN, Kp // TK)
    out = pl.pallas_call(
        _MM_KERNELS[epilogue],
        out_shape=jax.ShapeDtypeStruct((Mp, Np), out_dtype),
        grid=grid,
        in_specs=[pl.BlockSpec((TM, TK), lambda i, j, k: (i, k)),
                  pl.BlockSpec((TK, TN), lambda i, j, k: (k, j)),
                  pl.BlockSpec((8, TN), lambda i, j, k: (0, j)),
                  pl.BlockSpec((8, TN), lambda i, j, k: (0, j))],
        out_specs=pl.BlockSpec((TM, TN), lambda i, j, k: (i, j)),
        scratch_shapes=[pltpu.VMEM((TM, TN), jnp.float32)],
        compiler_params=pltpu.CompilerParams(
            dimension_semantics=("parallel", "parallel", "arbitrary")),
    )(a, b, r0, r1)
    if (Mp, Np) != (M, N):
        out = out[:M, :N]
    return out


def matmul_fused(a, b, *, bias=None, alpha=None, epilogue='none',
                 out_dtype=jnp.bfloat16):
    return _matmul_impl(a, b, bias, alpha, epilogue=epilogue,
                        out_dtype=out_dtype)


# ----------------------------------------------------------------------------
# Conv3d = bf16 im2col (XLA glue) + fused Pallas matmul epilogue
# ----------------------------------------------------------------------------
@partial(jax.jit,
         static_argnames=('ksize', 'stride', 'padding', 'epilogue', 'out_dtype'))
def _conv3d_impl(x5, w2, bias, alpha, *, ksize, stride, padding, epilogue,
                 out_dtype):
    N, D, H, W, C = x5.shape
    kd, kh, kw = ksize
    sd, sh, sw = stride
    p = padding
    Do = (D + 2 * p - kd) // sd + 1
    Ho = (H + 2 * p - kh) // sh + 1
    Wo = (W + 2 * p - kw) // sw + 1
    x5 = x5.astype(jnp.bfloat16)
    xp = jnp.pad(x5, ((0, 0), (p, p), (p, p), (p, p), (0, 0))) if p else x5
    cols = []
    for dz in range(kd):
        for dy in range(kh):
            for dx in range(kw):
                cols.append(xp[:, dz:dz + (Do - 1) * sd + 1:sd,
                                  dy:dy + (Ho - 1) * sh + 1:sh,
                                  dx:dx + (Wo - 1) * sw + 1:sw, :])
    K = kd * kh * kw * C
    Kw = w2.shape[0]
    if Kw > K:   # weight rows were pre-padded to a lane-friendly K at init
        cols.append(jnp.zeros((N, Do, Ho, Wo, Kw - K), jnp.bfloat16))
    a = jnp.concatenate(cols, axis=-1).reshape(N * Do * Ho * Wo, -1)
    out2 = _matmul_impl(a, w2, bias, alpha, epilogue=epilogue,
                        out_dtype=out_dtype)
    return out2.reshape(N, Do, Ho, Wo, w2.shape[1])


def conv3d(x5, conv, *, stride, padding, bias=None, alpha=None,
           epilogue='none', out_dtype=jnp.bfloat16):
    s = (stride, stride, stride) if isinstance(stride, int) else tuple(stride)
    return _conv3d_impl(x5, conv['w2'], bias, alpha, ksize=conv['ksize'],
                        stride=s, padding=padding, epilogue=epilogue,
                        out_dtype=out_dtype)


# ----------------------------------------------------------------------------
# BatchNorm3d (training-mode batch stats) + optional fused PReLU
# Two-pass, row-tiled: (1) accumulate per-channel sum / sumsq, (2) normalize.
# ----------------------------------------------------------------------------
def _bn_stats_kernel(x_ref, stat_ref):
    @pl.when(pl.program_id(0) == 0)
    def _():
        stat_ref[...] = jnp.zeros_like(stat_ref)

    x = x_ref[...].astype(jnp.float32)
    s = jnp.sum(x, axis=0, keepdims=True)
    ss = jnp.sum(x * x, axis=0, keepdims=True)
    stat_ref[...] += jnp.concatenate(
        [s, ss, jnp.zeros((6, x.shape[1]), jnp.float32)], axis=0)


def _make_bn_apply_kernel(M):
    inv = 1.0 / float(M)

    def kernel(x_ref, st_ref, g_ref, b_ref, a_ref, o_ref):
        mean = st_ref[0:1, :] * inv
        var = jnp.maximum(st_ref[1:2, :] * inv - mean * mean, 0.0)
        x = x_ref[...].astype(jnp.float32)
        y = (x - mean) * jax.lax.rsqrt(var + 1e-5) * g_ref[0:1, :] + b_ref[0:1, :]
        o_ref[...] = jnp.where(y > 0, y, a_ref[0:1, :] * y).astype(o_ref.dtype)

    return kernel


@jax.jit
def _batchnorm_impl(x2, gamma, beta, alpha):
    M, C = x2.shape
    tm = 512 if M >= 512 else _ru(M, 8)
    Mp = _ru(M, tm)
    xp = jnp.pad(x2, ((0, Mp - M), (0, 0))) if Mp != M else x2  # zero rows: no stats effect
    g8 = jnp.tile(gamma.astype(jnp.float32).reshape(1, C), (8, 1))
    b8 = jnp.tile(beta.astype(jnp.float32).reshape(1, C), (8, 1))
    a8 = jnp.tile(alpha.astype(jnp.float32).reshape(1, C), (8, 1))
    T = Mp // tm

    stats = pl.pallas_call(
        _bn_stats_kernel,
        out_shape=jax.ShapeDtypeStruct((8, C), jnp.float32),
        grid=(T,),
        in_specs=[pl.BlockSpec((tm, C), lambda t: (t, 0))],
        out_specs=pl.BlockSpec((8, C), lambda t: (0, 0)),
        compiler_params=pltpu.CompilerParams(
            dimension_semantics=("arbitrary",)),
    )(xp)

    out = pl.pallas_call(
        _make_bn_apply_kernel(M),
        out_shape=jax.ShapeDtypeStruct((Mp, C), jnp.bfloat16),
        grid=(T,),
        in_specs=[pl.BlockSpec((tm, C), lambda t: (t, 0)),
                  pl.BlockSpec((8, C), lambda t: (0, 0)),
                  pl.BlockSpec((8, C), lambda t: (0, 0)),
                  pl.BlockSpec((8, C), lambda t: (0, 0)),
                  pl.BlockSpec((8, C), lambda t: (0, 0))],
        out_specs=pl.BlockSpec((tm, C), lambda t: (t, 0)),
        compiler_params=pltpu.CompilerParams(
            dimension_semantics=("parallel",)),
    )(xp, stats, g8, b8, a8)
    return out[:M] if Mp != M else out


def batchnorm(x2, gamma, beta, alpha=None):
    C = x2.shape[1]
    if alpha is None:                 # PReLU with slope 1 == identity
        alpha = jnp.ones((C,), jnp.float32)
    return _batchnorm_impl(x2, gamma, beta, alpha)


# ----------------------------------------------------------------------------
# SE gate * x + shortcut (fused), and a plain residual add
# ----------------------------------------------------------------------------
def _se_add_kernel(x_ref, sc_ref, s_ref, o_ref):
    o_ref[...] = (x_ref[...].astype(jnp.float32) * s_ref[0:1, :]
                  + sc_ref[...].astype(jnp.float32)).astype(o_ref.dtype)


@jax.jit
def _se_scale_add_impl(x2, sc2, sgate):
    M, C = x2.shape
    Ns = sgate.shape[0]
    S = M // Ns
    tm = min(256, S) if S >= 8 else 8
    if S < 8 or S % tm != 0:
        # tiny tail case (spatial 1x1x1): plain XLA, a few rows only
        sf = jnp.repeat(sgate.astype(jnp.float32), S, axis=0)
        return (x2.astype(jnp.float32) * sf
                + sc2.astype(jnp.float32)).astype(jnp.bfloat16)
    bps = S // tm                                   # row tiles per sample
    srep = jnp.repeat(sgate.astype(jnp.float32), 8, axis=0)   # (Ns*8, C)
    return pl.pallas_call(
        _se_add_kernel,
        out_shape=jax.ShapeDtypeStruct((M, C), jnp.bfloat16),
        grid=(M // tm,),
        in_specs=[pl.BlockSpec((tm, C), lambda i: (i, 0)),
                  pl.BlockSpec((tm, C), lambda i: (i, 0)),
                  pl.BlockSpec((8, C), lambda i: (i // bps, 0))],
        out_specs=pl.BlockSpec((tm, C), lambda i: (i, 0)),
        compiler_params=pltpu.CompilerParams(
            dimension_semantics=("parallel",)),
    )(x2, sc2, srep)


def _add_kernel(x_ref, y_ref, o_ref):
    o_ref[...] = (x_ref[...].astype(jnp.float32)
                  + y_ref[...].astype(jnp.float32)).astype(o_ref.dtype)


@jax.jit
def _add_impl(x2, y2):
    M, C = x2.shape
    tm = 512 if M >= 512 else _ru(M, 8)
    Mp = _ru(M, tm)
    xp = jnp.pad(x2, ((0, Mp - M), (0, 0))) if Mp != M else x2
    yp = jnp.pad(y2, ((0, Mp - M), (0, 0))) if Mp != M else y2
    out = pl.pallas_call(
        _add_kernel,
        out_shape=jax.ShapeDtypeStruct((Mp, C), jnp.bfloat16),
        grid=(Mp // tm,),
        in_specs=[pl.BlockSpec((tm, C), lambda i: (i, 0)),
                  pl.BlockSpec((tm, C), lambda i: (i, 0))],
        out_specs=pl.BlockSpec((tm, C), lambda i: (i, 0)),
        compiler_params=pltpu.CompilerParams(
            dimension_semantics=("parallel",)),
    )(xp, yp)
    return out[:M] if Mp != M else out


# ----------------------------------------------------------------------------
# Model pieces (channels-last NDHWC bf16 activations end-to-end)
# ----------------------------------------------------------------------------
def bottleneck_forward(blk, x5):
    N, D, H, W, C = x5.shape
    s = blk['stride']
    xs5 = x5 if s == 1 else x5[:, ::s, ::s, ::s, :]
    No, Do, Ho, Wo = xs5.shape[:4]
    if 'short_w' in blk:                       # Conv3d 1x1x1 (stride) + BN
        sc2 = matmul_fused(xs5.reshape(-1, C), blk['short_w'], epilogue='none')
        sc2 = batchnorm(sc2, *blk['short_bn'])
    else:                                      # MaxPool3d(kernel=1, stride)
        sc2 = xs5.reshape(-1, C)

    r2 = batchnorm(x5.reshape(-1, C), *blk['bn1'])
    r5 = conv3d(r2.reshape(N, D, H, W, C), blk['conv1'], stride=1, padding=1,
                epilogue='prelu', alpha=blk['prelu'])
    r5 = conv3d(r5, blk['conv2'], stride=s, padding=1, epilogue='none')
    Co = r5.shape[-1]
    r2 = batchnorm(r5.reshape(-1, Co), *blk['bn2'])

    # SE: AdaptiveAvgPool3d(1) -> fc1+ReLU -> fc2+Sigmoid -> x*gate + shortcut
    S = Do * Ho * Wo
    # TODO(synk): global average pool kept in plain XLA (tiny (N,C) result).
    pooled = jnp.mean(r2.reshape(No, S, Co).astype(jnp.float32), axis=1)
    g = matmul_fused(pooled, blk['se_fc1'], epilogue='relu',
                     out_dtype=jnp.float32)
    g = matmul_fused(g, blk['se_fc2'], epilogue='sigmoid',
                     out_dtype=jnp.float32)
    out2 = _se_scale_add_impl(r2, sc2, g)
    return out2.reshape(No, Do, Ho, Wo, Co)


def _interp_mat(out_s, in_s):
    # 1-D linear interpolation matrix, align_corners=True
    M = np.zeros((out_s, in_s), np.float32)
    if in_s == 1 or out_s == 1:
        M[:, 0] = 1.0
        return jnp.asarray(M)
    scale = (in_s - 1) / (out_s - 1)
    for i in range(out_s):
        src = i * scale
        i0 = min(int(np.floor(src)), in_s - 1)
        i1 = min(i0 + 1, in_s - 1)
        w = src - i0
        M[i, i0] += 1.0 - w
        M[i, i1] += w
    return jnp.asarray(M)


def upsample_add(x5, y5):
    # TODO(synk): trilinear (align_corners=True) resize kept as tiny dense maps in XLA.
    N, d, h, w, C = x5.shape
    _, D, H, W, _ = y5.shape
    up = jnp.einsum('ndhwc,Dd,Hh,Ww->nDHWc', x5.astype(jnp.float32),
                    _interp_mat(D, d), _interp_mat(H, h), _interp_mat(W, w))
    out2 = _add_impl(up.reshape(-1, C), y5.reshape(-1, C))
    return out2.reshape(N, D, H, W, C)


def lateral_conv(x5, lat):
    N, D, H, W, C = x5.shape
    y2 = matmul_fused(x5.reshape(-1, C), lat['w'], bias=lat['b'],
                      epilogue='bias')
    return y2.reshape(N, D, H, W, lat['w'].shape[1])


def style_forward(sp, x5):
    h = x5
    for cv in sp['convs']:
        h = conv3d(h, cv['conv'], stride=cv['stride'], padding=1,
                   bias=cv['bias'], epilogue='bias_leaky')
    N, D, H, W, C = h.shape
    # torch .view(-1, out_c) is over the NCDHW layout
    flat = jnp.transpose(h, (0, 4, 1, 2, 3)).reshape(-1, C)
    return matmul_fused(flat, sp['lin_w'], bias=sp['lin_b'], epilogue='bias',
                        out_dtype=jnp.float32)


def psp_forward(P, x):
    x5 = jnp.transpose(x, (0, 2, 3, 4, 1)).astype(jnp.bfloat16)   # NCDHW -> NDHWC
    h = conv3d(x5, P['input_conv'], stride=1, padding=1, epilogue='none')
    N, D, H, W, C = h.shape
    h = batchnorm(h.reshape(-1, C), P['input_bn'][0], P['input_bn'][1],
                  alpha=P['input_prelu']).reshape(N, D, H, W, C)
    c1 = c2 = c3 = None
    for i, blk in enumerate(P['blocks']):
        h = bottleneck_forward(blk, h)
        if i == 6:
            c1 = h
        elif i == 20:
            c2 = h
        elif i == 23:
            c3 = h
    latents = [style_forward(P['styles'][j], c3) for j in range(4)]
    p2 = upsample_add(c3, lateral_conv(c2, P['lat1']))
    latents += [style_forward(P['styles'][j], p2) for j in range(4, 8)]
    p1 = upsample_add(p2, lateral_conv(c1, P['lat2']))
    latents += [style_forward(P['styles'][j], p1) for j in range(8, 12)]
    return jnp.stack(latents, axis=1).astype(jnp.float32)   # (N, 12, 512)


# ----------------------------------------------------------------------------
# Deterministic parameter construction (same shapes as pSp, weights stored
# pre-reshaped to (K, O) bf16 for the fused matmul)
# ----------------------------------------------------------------------------
def _prep_conv(w):                  # torch (O, Cin, kd, kh, kw)
    O, Cin, kd, kh, kw = w.shape
    K = kd * kh * kw * Cin
    w2 = jnp.transpose(w, (2, 3, 4, 1, 0)).reshape(K, O)
    Kp = _ru(K, 8) if K <= 128 else _ru(K, 128)
    if Kp != K:
        w2 = jnp.pad(w2, ((0, Kp - K), (0, 0)))
    return {'w2': w2.astype(jnp.bfloat16), 'ksize': (kd, kh, kw)}


def _prep_1x1(w):                   # torch (O, Cin, 1, 1, 1) -> (Cin, O)
    O, Cin = w.shape[0], w.shape[1]
    return jnp.transpose(w.reshape(O, Cin), (1, 0)).astype(jnp.bfloat16)


def _blocks_cfg():
    def grp(in_c, d, n, s=2):
        return [(in_c, d, s)] + [(d, d, 1)] * (n - 1)
    return grp(64, 64, 3) + grp(64, 128, 4) + grp(128, 256, 14) + grp(256, 512, 3)


def init_params(seed=0):
    keys = iter(jax.random.split(jax.random.PRNGKey(seed), 2048))
    nk = lambda: next(keys)

    def conv_w(out_c, in_c, k):
        fan = in_c * k[0] * k[1] * k[2]
        return jax.random.normal(nk(), (out_c, in_c) + k, jnp.float32) / np.sqrt(fan)

    P = {}
    P['input_conv'] = _prep_conv(conv_w(64, 1, (3, 3, 3)))
    P['input_bn'] = (jnp.ones(64, jnp.float32), jnp.zeros(64, jnp.float32))
    P['input_prelu'] = jnp.full((64,), 0.25, jnp.float32)

    blocks = []
    for (in_c, depth, stride) in _blocks_cfg():
        blk = {'stride': stride}
        if in_c != depth:
            blk['short_w'] = _prep_1x1(conv_w(depth, in_c, (1, 1, 1)))
            blk['short_bn'] = (jnp.ones(depth, jnp.float32),
                               jnp.zeros(depth, jnp.float32))
        blk['bn1'] = (jnp.ones(in_c, jnp.float32), jnp.zeros(in_c, jnp.float32))
        blk['conv1'] = _prep_conv(conv_w(depth, in_c, (3, 3, 3)))
        blk['prelu'] = jnp.full((depth,), 0.25, jnp.float32)
        blk['conv2'] = _prep_conv(conv_w(depth, depth, (3, 3, 3)))
        blk['bn2'] = (jnp.ones(depth, jnp.float32), jnp.zeros(depth, jnp.float32))
        blk['se_fc1'] = _prep_1x1(conv_w(depth // 16, depth, (1, 1, 1)))
        blk['se_fc2'] = _prep_1x1(conv_w(depth, depth // 16, (1, 1, 1)))
        blocks.append(blk)
    P['blocks'] = blocks

    styles = []
    for i in range(12):
        spatial = 12 if i < 4 else (24 if i < 8 else 48)
        num_pools = int(np.log2(spatial * 2 / 3))
        strides = [(2, 2, 2)] * num_pools + [(2, 2, 1)]
        convs = []
        for s in strides:
            convs.append({'conv': _prep_conv(conv_w(512, 512, (3, 3, 3))),
                          'bias': 0.01 * jax.random.normal(nk(), (512,), jnp.float32),
                          'stride': s})
        lw = jax.random.normal(nk(), (512, 512), jnp.float32) / np.sqrt(512)
        styles.append({'convs': convs,
                       'lin_w': jnp.transpose(lw).astype(jnp.bfloat16),
                       'lin_b': jnp.zeros((512,), jnp.float32)})
    P['styles'] = styles

    P['lat1'] = {'w': _prep_1x1(conv_w(512, 256, (1, 1, 1))),
                 'b': 0.01 * jax.random.normal(nk(), (512,), jnp.float32)}
    P['lat2'] = {'w': _prep_1x1(conv_w(512, 128, (1, 1, 1))),
                 'b': 0.01 * jax.random.normal(nk(), (512,), jnp.float32)}
    return P


if __name__ == "__main__":
    params = init_params(0)
    # batch=2 so training-mode BatchNorm is well defined even at 1^3 spatial
    x = jax.random.normal(jax.random.PRNGKey(0), (2, 1, 16, 16, 16), jnp.float32)
    out = psp_forward(params, x)
    out = jax.block_until_ready(out)
    assert out.shape == (2, 12, 512) and out.dtype == jnp.float32
    assert bool(jnp.all(jnp.isfinite(out)))
    print("KERNEL_OK")
</pallas_src>

<mosaic_0001>
module attributes {stable_mosaic.version = 11 : i64} {
  func.func @kernel(%arg0: i32, %arg1: i32, %arg2: i32, %arg3: memref<512x32xbf16, #tpu.memory_space<vmem>>, %arg4: memref<32x64xbf16, #tpu.memory_space<vmem>>, %arg5: memref<8x64xf32, #tpu.memory_space<vmem>>, %arg6: memref<8x64xf32, #tpu.memory_space<vmem>>, %arg7: memref<512x64xbf16, #tpu.memory_space<vmem>>, %arg8: memref<512x64xf32, #tpu.memory_space<vmem>>) attributes {dimension_semantics = [#tpu.dimension_semantics<parallel>, #tpu.dimension_semantics<parallel>, #tpu.dimension_semantics<arbitrary>], iteration_bounds = array<i64: 16, 1, 1>, scalar_prefetch = 0 : i64, scratch_operands = 1 : i64, tpu.core_type = #tpu.core_type<tc>, window_params = [{transform_indices = @transform_0, window_bounds = array<i64: 512, 32>}, {transform_indices = @transform_1, window_bounds = array<i64: 32, 64>}, {transform_indices = @transform_2, window_bounds = array<i64: 8, 64>}, {transform_indices = @transform_3, window_bounds = array<i64: 8, 64>}, {transform_indices = @transform_4, window_bounds = array<i64: 512, 64>}]} {
    %c0_i32 = arith.constant 0 : i32
    %0 = arith.cmpi eq, %arg2, %c0_i32 : i32
    %1 = arith.extui %0 : i1 to i32
    %c0_i32_0 = arith.constant 0 : i32
    %2 = arith.cmpi ne, %1, %c0_i32_0 : i32
    scf.if %2 {
      %cst_10 = arith.constant 0.000000e+00 : f32
      %12 = vector.broadcast %cst_10 : f32 to vector<512x64xf32>
      %c0_11 = arith.constant 0 : index
      %c0_12 = arith.constant 0 : index
      %13 = vector.load %arg8[%c0_11, %c0_12] : memref<512x64xf32, #tpu.memory_space<vmem>>, vector<512x64xf32>
      tpu.vector_store %arg8[%c0_11, %c0_12], %12 {strides = array<i32>} : memref<512x64xf32, #tpu.memory_space<vmem>>, vector<512x64xf32>,
    } else {
    }
    %c0 = arith.constant 0 : index
    %c0_1 = arith.constant 0 : index
    %3 = vector.load %arg8[%c0, %c0_1] : memref<512x64xf32, #tpu.memory_space<vmem>>, vector<512x64xf32>
    %c0_2 = arith.constant 0 : index
    %c0_3 = arith.constant 0 : index
    %4 = vector.load %arg3[%c0_2, %c0_3] : memref<512x32xbf16, #tpu.memory_space<vmem>>, vector<512x32xbf16>
    %c0_4 = arith.constant 0 : index
    %c0_5 = arith.constant 0 : index
    %5 = vector.load %arg4[%c0_4, %c0_5] : memref<32x64xbf16, #tpu.memory_space<vmem>>, vector<32x64xbf16>
    %cst = arith.constant dense<0.000000e+00> : vector<512x64xf32>
    %6 = tpu.matmul %4, %5, %cst {dimension_numbers = #tpu.dot_dimension_numbers<[1], [0], [0], [1], [0, 0, 1, 1], [], []>} : vector<512x32xbf16>, vector<32x64xbf16>, vector<512x64xf32> -> vector<512x64xf32>
    %7 = arith.addf %3, %6 : vector<512x64xf32>
    %c0_6 = arith.constant 0 : index
    %c0_7 = arith.constant 0 : index
    %8 = vector.load %arg8[%c0_6, %c0_7] : memref<512x64xf32, #tpu.memory_space<vmem>>, vector<512x64xf32>
    tpu.vector_store %arg8[%c0_6, %c0_7], %7 {strides = array<i32>} : memref<512x64xf32, #tpu.memory_space<vmem>>, vector<512x64xf32>,
    %c0_i32_8 = arith.constant 0 : i32
    %9 = arith.cmpi eq, %arg2, %c0_i32_8 : i32
    %10 = arith.extui %9 : i1 to i32
    %c0_i32_9 = arith.constant 0 : i32
    %11 = arith.cmpi ne, %10, %c0_i32_9 : i32
    scf.if %11 {
      %c0_10 = arith.constant 0 : index
      %c0_11 = arith.constant 0 : index
      %12 = vector.load %arg8[%c0_10, %c0_11] : memref<512x64xf32, #tpu.memory_space<vmem>>, vector<512x64xf32>
      %13 = arith.truncf %12 : vector<512x64xf32> to vector<512x64xbf16>
      %c0_12 = arith.constant 0 : index
      %c0_13 = arith.constant 0 : index
      %14 = vector.load %arg7[%c0_12, %c0_13] : memref<512x64xbf16, #tpu.memory_space<vmem>>, vector<512x64xbf16>
      tpu.vector_store %arg7[%c0_12, %c0_13], %13 {strides = array<i32>} : memref<512x64xbf16, #tpu.memory_space<vmem>>, vector<512x64xbf16>,
    } else {
    }
    return
  }
  func.func @transform_0(%arg0: i32, %arg1: i32, %arg2: i32) -> (i32, i32) {
    %c0_i32 = arith.constant 0 : i32
    return %arg0, %arg2 : i32, i32
  }
  func.func @transform_1(%arg0: i32, %arg1: i32, %arg2: i32) -> (i32, i32) {
    %c0_i32 = arith.constant 0 : i32
    return %arg2, %arg1 : i32, i32
  }
  func.func @transform_2(%arg0: i32, %arg1: i32, %arg2: i32) -> (i32, i32) {
    %c0_i32 = arith.constant 0 : i32
    %c0_i32_0 = arith.constant 0 : i32
    return %c0_i32, %arg1 : i32, i32
  }
  func.func @transform_3(%arg0: i32, %arg1: i32, %arg2: i32) -> (i32, i32) {
    %c0_i32 = arith.constant 0 : i32
    %c0_i32_0 = arith.constant 0 : i32
    return %c0_i32, %arg1 : i32, i32
  }
  func.func @transform_4(%arg0: i32, %arg1: i32, %arg2: i32) -> (i32, i32) {
    %c0_i32 = arith.constant 0 : i32
    return %arg0, %arg1 : i32, i32
  }
}

</mosaic_0001>

<bundles_post_ra>
// kernel: _matmul_impl.1
= control target key start
LH: loop header
LB: loop body
LE: loop exit
PB: predicated region body
PF: predicated region fallthrough
CT: control target
= control target key end

     0   :  { %s2135_s15 = smov 0   ;;  %s2137_s16 = smov 0   ;;  %s2575_s0 = inlined_call_operand.vmem [shape: bf16[8192,32], index: 0, kind: input, shape index: {}]   ;;  %s2576_s1 = inlined_call_operand.vmem [shape: bf16[32,64], index: 1, kind: input, shape index: {}]   ;;  %s2577_s2 = inlined_call_operand.vmem [shape: f32[8,64], index: 2, kind: input, shape index: {}, may-alias: {2,3}]   ;;  %s2578_s3 = inlined_call_operand.vmem [shape: f32[8,64], index: 3, kind: input, shape index: {}, may-alias: {2,3}]   ;;  %s2579_s4 = inlined_call_operand.vmem [shape: bf16[8192,64], index: 4, kind: output, shape index: {}]  }
   0x1   :  { %s2139_s17 = smov 0  }
   0x2 LB: > { %s33_s2 = sadd.s32 1, %s2103_s16  ;;  %p1719_p0 = scmp.ge.s32.totalorder %s2107_s17, 1  ;;  %s2107_s17 = sphi %s2139_s17, %s14_s17   ;;  %s2103_s16 = sphi %s2137_s16, %s2581_s16   ;;  %s2099_s15 = sphi %s2135_s15, %s2580_s15  }
   0x3   : > { %p35_p1 = scmp.ge.s32.totalorder %s33_s2, 16  ;;  %p223_p2 = scmp.lt.s32.totalorder %s2107_s17, 17 }
   0x5   : > { %s2583_s2 = smov (%p35_p1, %s33_s2), 0  ;;  %p224_p3 = pnand %p1719_p0, %p223_p2 }
   0x6   : > { %v2051_v0 = vld [vmem:[%s2576_s1] sm:$0xff] (!%p224_p3)   ;;  %s1720_s19 = sshll.u32 (!%p224_p3), %s2099_s15, 6  ;;  %v2159_v1 = vld [vmem:[%s2576_s1 + $0x8] sm:$0xff] (!%p224_p3)   ;;  %vm311_vm0 = vcmask (!%p224_p3), 523264   ;;  %v2109_v2 = vmov (!%p224_p3), 0.0   ;;  %vm680_vm1 = vcmask (!%p224_p3), 261120  }
   0x7   : > { %227 = sbr.rel (%p224_p3) target bundleno = 310 (0x136), region = 36  ;;  %p272_p4 = scmp.lt.s32.totalorder (!%p224_p3), %s1720_s19, 1023  ;;  %1954 = vmatprep.subr.bf16.mxu0 (!%p224_p3), %v2051_v0  ;;  %2022 = vmatprep.subr.bf16.mxu1 (!%p224_p3), %v2051_v0  ;;  %314 = vst.msk [vmem:[#allocation2 + $0x10] sm:$0xff] (!%p224_p3), %vm311_vm0, %v2109_v2  ;;  %312 = vst.msk [vmem:[#allocation2] sm:$0xff] (!%p224_p3), %vm311_vm0, %v2109_v2  ;;  %vm1518_vm2 = vcmask (!%p224_p3), 519168  }
   0x8   : > { %1955 = vmatpush3.bf16.msra.mxu0 (!%p224_p3), %v2051_v0  ;;  %2024 = vmatpush3.bf16.msra.mxu1 (!%p224_p3), %v2051_v0  ;;  %313 = vst.msk [vmem:[#allocation2 + $0x8] sm:$0xff] (!%p224_p3), %vm311_vm0, %v2109_v2  ;;  %315 = vst.msk [vmem:[#allocation2 + $0x18] sm:$0xff] (!%p224_p3), %vm311_vm0, %v2109_v2 }
   0x9   : > { %316 = vst.msk [vmem:[#allocation2 + $0x20] sm:$0xff] (!%p224_p3), %vm311_vm0, %v2109_v2  ;;  %317 = vst.msk [vmem:[#allocation2 + $0x28] sm:$0xff] (!%p224_p3), %vm311_vm0, %v2109_v2  ;;  %1956 = vmatprep.subr.bf16.mxu0 (!%p224_p3), %v2159_v1  ;;  %2023 = vmatprep.subr.bf16.mxu1 (!%p224_p3), %v2159_v1 }
   0xa   : > { %318 = vst.msk [vmem:[#allocation2 + $0x30] sm:$0xff] (!%p224_p3), %vm311_vm0, %v2109_v2  ;;  %319 = vst.msk [vmem:[#allocation2 + $0x38] sm:$0xff] (!%p224_p3), %vm311_vm0, %v2109_v2 }
   0xb   : > { %320 = vst.msk [vmem:[#allocation2 + $0x40] sm:$0xff] (!%p224_p3), %vm311_vm0, %v2109_v2  ;;  %321 = vst.msk [vmem:[#allocation2 + $0x48] sm:$0xff] (!%p224_p3), %vm311_vm0, %v2109_v2 }
   0xc   : > { %322 = vst.msk [vmem:[#allocation2 + $0x50] sm:$0xff] (!%p224_p3), %vm311_vm0, %v2109_v2  ;;  %323 = vst.msk [vmem:[#allocation2 + $0x58] sm:$0xff] (!%p224_p3), %vm311_vm0, %v2109_v2  ;;  %1957 = vmatpush3.bf16.msra.mxu0 (!%p224_p3), %v2159_v1  ;;  %2025 = vmatpush3.bf16.msra.mxu1 (!%p224_p3), %v2159_v1 }
   0xd   : > { %324 = vst.msk [vmem:[#allocation2 + $0x60] sm:$0xff] (!%p224_p3), %vm311_vm0, %v2109_v2  ;;  %325 = vst.msk [vmem:[#allocation2 + $0x68] sm:$0xff] (!%p224_p3), %vm311_vm0, %v2109_v2 }
   0xe   : > { %s2585_s19 = smov (!%p272_p4, %s1720_s19), 1023  ;;  %326 = vst.msk [vmem:[#allocation2 + $0x70] sm:$0xff] %vm311_vm0, %v2109_v2  ;;  %327 = vst.msk [vmem:[#allocation2 + $0x78] sm:$0xff] %vm311_vm0, %v2109_v2  ;;  %v378_v35 = vld [vmem:[#allocation2 + $0x10] sm:$0xff]  ;;  %v376_v37 = vld [vmem:[#allocation2] sm:$0xff] }
   0xf   : > { %328 = vst.msk [vmem:[#allocation2 + $0x80] sm:$0xff] %vm311_vm0, %v2109_v2  ;;  %329 = vst.msk [vmem:[#allocation2 + $0x88] sm:$0xff] %vm311_vm0, %v2109_v2  ;;  %s1721_s22 = sshll.u32 %s2585_s19, 2  ;;  %v379_v40 = vld [vmem:[#allocation2 + $0x18] sm:$0xff]  ;;  %v377_v45 = vld [vmem:[#allocation2 + $0x8] sm:$0xff] }
  0x10   : > { %330 = vst.msk [vmem:[#allocation2 + $0x90] sm:$0xff] %vm311_vm0, %v2109_v2  ;;  %331 = vst.msk [vmem:[#allocation2 + $0x98] sm:$0xff] %vm311_vm0, %v2109_v2  ;;  %s2299_s25 = scalar_lea.vmem %s2575_s0, %s1721_s22  ;;  %v380_v61 = vld [vmem:[#allocation2 + $0x20] sm:$0xff]  ;;  %s2380_s28 = scalar_lea.vmem %s2579_s4, %s1721_s22 }
  0x11   : > { %332 = vst.msk [vmem:[#allocation2 + $0xa0] sm:$0xff] %vm311_vm0, %v2109_v2  ;;  %333 = vst.msk [vmem:[#allocation2 + $0xa8] sm:$0xff] %vm311_vm0, %v2109_v2  ;;  %v2053_v3 = vld [vmem:[%s2299_s25] sm:$0xff]   ;;  %v2055_v5 = vld [vmem:[%s2299_s25 + $0x8] sm:$0xff]  }
  0x12   : > { %334 = vst.msk [vmem:[#allocation2 + $0xb0] sm:$0xff] %vm311_vm0, %v2109_v2  ;;  %335 = vst.msk [vmem:[#allocation2 + $0xb8] sm:$0xff] %vm311_vm0, %v2109_v2  ;;  %v2054_v4 = vld [vmem:[%s2299_s25 + $0x80] sm:$0xff]   ;;  %1958 = vmatprep.mubr.msk.bf16.mxu0 %vm680_vm1, %v2053_v3  ;;  %v2056_v6 = vld [vmem:[%s2299_s25 + $0x88] sm:$0xff]  }
  0x13   : > { %336 = vst.msk [vmem:[#allocation2 + $0xc0] sm:$0xff] %vm311_vm0, %v2109_v2  ;;  %337 = vst.msk [vmem:[#allocation2 + $0xc8] sm:$0xff] %vm311_vm0, %v2109_v2  ;;  %1990 = vmatprep.mubr.msk.bf16.mxu1 %vm680_vm1, %v2054_v4  ;;  %1959 = vmatmul.mubr.msk.bf16.vlgmr.msra.gmra.mrb[0].mxu0 %vm680_vm1, %v2055_v5  ;;  %v2057_v7 = vld [vmem:[%s2299_s25 + $0x10] sm:$0xff]   ;;  %v2059_v9 = vld [vmem:[%s2299_s25 + $0x18] sm:$0xff]  }
  0x14   : > { %338 = vst.msk [vmem:[#allocation2 + $0xd0] sm:$0xff] %vm311_vm0, %v2109_v2  ;;  %339 = vst.msk [vmem:[#allocation2 + $0xd8] sm:$0xff] %vm311_vm0, %v2109_v2  ;;  %1991 = vmatmul.mubr.msk.bf16.vlgmr.msra.gmra.mrb[0].mxu1 %vm680_vm1, %v2056_v6  ;;  %v2058_v8 = vld [vmem:[%s2299_s25 + $0x90] sm:$0xff]   ;;  %1962 = vmatprep.mubr.msk.bf16.mxu0 %vm680_vm1, %v2057_v7  ;;  %v2060_v10 = vld [vmem:[%s2299_s25 + $0x98] sm:$0xff]  }
  0x15   : > { %340 = vst.msk [vmem:[#allocation2 + $0xe0] sm:$0xff] %vm311_vm0, %v2109_v2  ;;  %341 = vst.msk [vmem:[#allocation2 + $0xe8] sm:$0xff] %vm311_vm0, %v2109_v2  ;;  %1994 = vmatprep.mubr.msk.bf16.mxu1 %vm680_vm1, %v2058_v8  ;;  %v2061_v11 = vld [vmem:[%s2299_s25 + $0x20] sm:$0xff]   ;;  %v2063_v13 = vld [vmem:[%s2299_s25 + $0x28] sm:$0xff]  }
  0x16   : > { %342 = vst.msk [vmem:[#allocation2 + $0xf0] sm:$0xff] %vm311_vm0, %v2109_v2  ;;  %343 = vst.msk [vmem:[#allocation2 + $0xf8] sm:$0xff] %vm311_vm0, %v2109_v2  ;;  %v2062_v12 = vld [vmem:[%s2299_s25 + $0xa0] sm:$0xff]   ;;  %v2064_v14 = vld [vmem:[%s2299_s25 + $0xa8] sm:$0xff]  }
  0x17   : > { %344 = vst.msk [vmem:[#allocation2 + $0x100] sm:$0xff] %vm311_vm0, %v2109_v2  ;;  %345 = vst.msk [vmem:[#allocation2 + $0x108] sm:$0xff] %vm311_vm0, %v2109_v2  ;;  %v2065_v15 = vld [vmem:[%s2299_s25 + $0x30] sm:$0xff]   ;;  %v2067_v17 = vld [vmem:[%s2299_s25 + $0x38] sm:$0xff]  }
  0x18   : > { %346 = vst.msk [vmem:[#allocation2 + $0x110] sm:$0xff] %vm311_vm0, %v2109_v2  ;;  %347 = vst.msk [vmem:[#allocation2 + $0x118] sm:$0xff] %vm311_vm0, %v2109_v2  ;;  %v2066_v16 = vld [vmem:[%s2299_s25 + $0xb0] sm:$0xff]   ;;  %v2068_v18 = vld [vmem:[%s2299_s25 + $0xb8] sm:$0xff]  }
  0x19   : > { %348 = vst.msk [vmem:[#allocation2 + $0x120] sm:$0xff] %vm311_vm0, %v2109_v2  ;;  %349 = vst.msk [vmem:[#allocation2 + $0x128] sm:$0xff] %vm311_vm0, %v2109_v2  ;;  %v2069_v19 = vld [vmem:[%s2299_s25 + $0x40] sm:$0xff]   ;;  %v2071_v21 = vld [vmem:[%s2299_s25 + $0x48] sm:$0xff]  }
  0x1a   : > { %350 = vst.msk [vmem:[#allocation2 + $0x130] sm:$0xff] %vm311_vm0, %v2109_v2  ;;  %351 = vst.msk [vmem:[#allocation2 + $0x138] sm:$0xff] %vm311_vm0, %v2109_v2  ;;  %v2070_v20 = vld [vmem:[%s2299_s25 + $0xc0] sm:$0xff]   ;;  %v2072_v22 = vld [vmem:[%s2299_s25 + $0xc8] sm:$0xff]  }
  0x1b   : > { %352 = vst.msk [vmem:[#allocation2 + $0x140] sm:$0xff] %vm311_vm0, %v2109_v2  ;;  %353 = vst.msk [vmem:[#allocation2 + $0x148] sm:$0xff] %vm311_vm0, %v2109_v2  ;;  %1963 = vmatmul.mubr.msk.bf16.gmra.mrb[4].mxu0 %vm680_vm1, %v2059_v9  ;;  %v2073_v23 = vld [vmem:[%s2299_s25 + $0x50] sm:$0xff]   ;;  %v2075_v25 = vld [vmem:[%s2299_s25 + $0x58] sm:$0xff]  }
  0x1c   : > { %354 = vst.msk [vmem:[#allocation2 + $0x150] sm:$0xff] %vm311_vm0, %v2109_v2  ;;  %355 = vst.msk [vmem:[#allocation2 + $0x158] sm:$0xff] %vm311_vm0, %v2109_v2  ;;  %1995 = vmatmul.mubr.msk.bf16.gmra.mrb[4].mxu1 %vm680_vm1, %v2060_v10  ;;  %1966 = vmatprep.mubr.msk.bf16.mxu0 %vm680_vm1, %v2061_v11  ;;  %v2074_v24 = vld [vmem:[%s2299_s25 + $0xd0] sm:$0xff]   ;;  %v2076_v26 = vld [vmem:[%s2299_s25 + $0xd8] sm:$0xff]  }
  0x1d   : > { %356 = vst.msk [vmem:[#allocation2 + $0x160] sm:$0xff] %vm311_vm0, %v2109_v2  ;;  %357 = vst.msk [vmem:[#allocation2 + $0x168] sm:$0xff] %vm311_vm0, %v2109_v2  ;;  %1998 = vmatprep.mubr.msk.bf16.mxu1 %vm680_vm1, %v2062_v12  ;;  %v2077_v27 = vld [vmem:[%s2299_s25 + $0x60] sm:$0xff]   ;;  %v2079_v29 = vld [vmem:[%s2299_s25 + $0x68] sm:$0xff]  }
  0x1e   : > { %358 = vst.msk [vmem:[#allocation2 + $0x170] sm:$0xff] %vm311_vm0, %v2109_v2  ;;  %359 = vst.msk [vmem:[#allocation2 + $0x178] sm:$0xff] %vm311_vm0, %v2109_v2  ;;  %v2078_v28 = vld [vmem:[%s2299_s25 + $0xe0] sm:$0xff]   ;;  %v2080_v30 = vld [vmem:[%s2299_s25 + $0xe8] sm:$0xff]  }
  0x1f   : > { %360 = vst.msk [vmem:[#allocation2 + $0x180] sm:$0xff] %vm311_vm0, %v2109_v2  ;;  %361 = vst.msk [vmem:[#allocation2 + $0x188] sm:$0xff] %vm311_vm0, %v2109_v2  ;;  %v2081_v31 = vld [vmem:[%s2299_s25 + $0x70] sm:$0xff]   ;;  %v2083_v33 = vld [vmem:[%s2299_s25 + $0x78] sm:$0xff]  }
  0x20   : > { %362 = vst.msk [vmem:[#allocation2 + $0x190] sm:$0xff] %vm311_vm0, %v2109_v2  ;;  %363 = vst.msk [vmem:[#allocation2 + $0x198] sm:$0xff] %vm311_vm0, %v2109_v2  ;;  %v2082_v32 = vld [vmem:[%s2299_s25 + $0xf0] sm:$0xff]   ;;  %v2084_v34 = vld [vmem:[%s2299_s25 + $0xf8] sm:$0xff]  }
  0x21   : > { %364 = vst.msk [vmem:[#allocation2 + $0x1a0] sm:$0xff] %vm311_vm0, %v2109_v2  ;;  %365 = vst.msk [vmem:[#allocation2 + $0x1a8] sm:$0xff] %vm311_vm0, %v2109_v2  ;;  %v410_v36 = vld [vmem:[#allocation2 + $0x110] sm:$0xff]  ;;  %v408_v39 = vld [vmem:[#allocation2 + $0x100] sm:$0xff] }
  0x22   : > { %366 = vst.msk [vmem:[#allocation2 + $0x1b0] sm:$0xff] %vm311_vm0, %v2109_v2  ;;  %367 = vst.msk [vmem:[#allocation2 + $0x1b8] sm:$0xff] %vm311_vm0, %v2109_v2  ;;  %v411_v44 = vld [vmem:[#allocation2 + $0x118] sm:$0xff]  ;;  %v409_v50 = vld [vmem:[#allocation2 + $0x108] sm:$0xff] }
  0x23   : > { %368 = vst.msk [vmem:[#allocation2 + $0x1c0] sm:$0xff] %vm311_vm0, %v2109_v2  ;;  %369 = vst.msk [vmem:[#allocation2 + $0x1c8] sm:$0xff] %vm311_vm0, %v2109_v2  ;;  %1967 = vmatmul.mubr.msk.bf16.gmra.mrb[8].mxu0 %vm680_vm1, %v2063_v13  ;;  %v382_v59 = vld [vmem:[#allocation2 + $0x30] sm:$0xff]  ;;  %v412_v63 = vld [vmem:[#allocation2 + $0x120] sm:$0xff] }
  0x24   : > { %370 = vst.msk [vmem:[#allocation2 + $0x1d0] sm:$0xff] %vm311_vm0, %v2109_v2  ;;  %371 = vst.msk [vmem:[#allocation2 + $0x1d8] sm:$0xff] %vm311_vm0, %v2109_v2  ;;  %1999 = vmatmul.mubr.msk.bf16.gmra.mrb[8].mxu1 %vm680_vm1, %v2064_v14  ;;  %1970 = vmatprep.mubr.msk.bf16.mxu0 %vm680_vm1, %v2065_v15  ;;  %v414_v60 = vld [vmem:[#allocation2 + $0x130] sm:$0xff]  ;;  %v383_v0 = vld [vmem:[#allocation2 + $0x38] sm:$0xff] }
  0x25   : > { %372 = vst.msk [vmem:[#allocation2 + $0x1e0] sm:$0xff] %vm311_vm0, %v2109_v2  ;;  %373 = vst.msk [vmem:[#allocation2 + $0x1e8] sm:$0xff] %vm311_vm0, %v2109_v2  ;;  %2002 = vmatprep.mubr.msk.bf16.mxu1 %vm680_vm1, %v2066_v16  ;;  %v415_v4 = vld [vmem:[#allocation2 + $0x138] sm:$0xff]  ;;  %v381_v5 = vld [vmem:[#allocation2 + $0x28] sm:$0xff] }
  0x26   : > { %374 = vst.msk [vmem:[#allocation2 + $0x1f0] sm:$0xff] %vm311_vm0, %v2109_v2  ;;  %375 = vst.msk [vmem:[#allocation2 + $0x1f8] sm:$0xff] %vm311_vm0, %v2109_v2  ;;  %v413_v11 = vld [vmem:[#allocation2 + $0x128] sm:$0xff] }
  0x2b   : > { %1971 = vmatmul.mubr.msk.bf16.gmra.mrb[12].mxu0 %vm680_vm1, %v2067_v17 }
  0x2c   : > { %2003 = vmatmul.mubr.msk.bf16.gmra.mrb[12].mxu1 %vm680_vm1, %v2068_v18  ;;  %1974 = vmatprep.mubr.msk.bf16.mxu0 %vm680_vm1, %v2069_v19 }
  0x2d   : > { %2006 = vmatprep.mubr.msk.bf16.mxu1 %vm680_vm1, %v2070_v20 }
  0x33   : > { %1975 = vmatmul.mubr.msk.bf16.gmra.mrb[16].mxu0 %vm680_vm1, %v2071_v21 }
  0x34   : > { %2007 = vmatmul.mubr.msk.bf16.gmra.mrb[16].mxu1 %vm680_vm1, %v2072_v22  ;;  %1978 = vmatprep.mubr.msk.bf16.mxu0 %vm680_vm1, %v2073_v23 }
  0x35   : > { %2010 = vmatprep.mubr.msk.bf16.mxu1 %vm680_vm1, %v2074_v24 }
  0x3b   : > { %1979 = vmatmul.mubr.msk.bf16.gmra.mrb[20].mxu0 %vm680_vm1, %v2075_v25 }
  0x3c   : > { %2011 = vmatmul.mubr.msk.bf16.gmra.mrb[20].mxu1 %vm680_vm1, %v2076_v26  ;;  %1982 = vmatprep.mubr.msk.bf16.mxu0 %vm680_vm1, %v2077_v27 }
  0x3d   : > { %2014 = vmatprep.mubr.msk.bf16.mxu1 %vm680_vm1, %v2078_v28 }
  0x43   : > { %1983 = vmatmul.mubr.msk.bf16.gmra.mrb[24].mxu0 %vm680_vm1, %v2079_v29 }
  0x44   : > { %2015 = vmatmul.mubr.msk.bf16.gmra.mrb[24].mxu1 %vm680_vm1, %v2080_v30  ;;  %1986 = vmatprep.mubr.msk.bf16.mxu0 %vm680_vm1, %v2081_v31 }
  0x45   : > { %2018 = vmatprep.mubr.msk.bf16.mxu1 %vm680_vm1, %v2082_v32 }
  0x4b   : > { %1987 = vmatmul.mubr.msk.bf16.gmra.mrb[28].mxu0 %vm680_vm1, %v2083_v33 }
  0x4c   : > { %2019 = vmatmul.mubr.msk.bf16.gmra.mrb[28].mxu1 %vm680_vm1, %v2084_v34  ;;  %v386_v34 = vld [vmem:[#allocation2 + $0x50] sm:$0xff] }
  0xe6   : > { %v1960_v38 = vpop.f32.mrb[0].mxu0 }
  0xe7   : > { %v1068_v41 = vadd.f32 %v1960_v38, %v378_v35  ;;  %v1992_v42 = vpop.f32.mrb[0].mxu1  ;;  %v811_v43 = vpop.f32.mrb[1].mxu0 }
  0xe8   : > { %v1100_v46 = vadd.f32 %v1992_v42, %v410_v36  ;;  %v1066_v47 = vadd.f32 %v811_v43, %v376_v37  ;;  %v939_v48 = vpop.f32.mrb[1].mxu1  ;;  %v1961_v49 = vpop.f32.mrb[2].mxu0  ;;  %v418_v36 = vld [vmem:[#allocation2 + $0x150] sm:$0xff]  ;;  %v384_v37 = vld [vmem:[#allocation2 + $0x40] sm:$0xff] }
  0xe9   : > { %1133 = vst.msk [vmem:[#allocation2 + $0x10] sm:$0xff] %vm311_vm0, %v1068_v41  ;;  %v1098_v51 = vadd.f32 %v939_v48, %v408_v39  ;;  %v1069_v52 = vadd.f32 %v1961_v49, %v379_v40  ;;  %v1993_v53 = vpop.f32.mrb[2].mxu1  ;;  %v814_v54 = vpop.f32.mrb[3].mxu0  ;;  %v416_v39 = vld [vmem:[#allocation2 + $0x140] sm:$0xff]  ;;  %v387_v40 = vld [vmem:[#allocation2 + $0x58] sm:$0xff] }
  0xea   : > { %1165 = vst.msk [vmem:[#allocation2 + $0x110] sm:$0xff] %vm311_vm0, %v1100_v46  ;;  %1131 = vst.msk [vmem:[#allocation2] sm:$0xff] %vm311_vm0, %v1066_v47  ;;  %v1101_v55 = vadd.f32 %v1993_v53, %v411_v44  ;;  %v1067_v56 = vadd.f32 %v814_v54, %v377_v45  ;;  %v942_v57 = vpop.f32.mrb[3].mxu1  ;;  %v419_v44 = vld [vmem:[#allocation2 + $0x158] sm:$0xff]  ;;  %v385_v45 = vld [vmem:[#allocation2 + $0x48] sm:$0xff] }
  0xeb   : > { %1163 = vst.msk [vmem:[#allocation2 + $0x100] sm:$0xff] %vm311_vm0, %v1098_v51  ;;  %1134 = vst.msk [vmem:[#allocation2 + $0x18] sm:$0xff] %vm311_vm0, %v1069_v52  ;;  %v1099_v58 = vadd.f32 %v942_v57, %v409_v50  ;;  %v417_v51 = vld [vmem:[#allocation2 + $0x148] sm:$0xff] }
  0xec   : > { %1166 = vst.msk [vmem:[#allocation2 + $0x118] sm:$0xff] %vm311_vm0, %v1101_v55  ;;  %1132 = vst.msk [vmem:[#allocation2 + $0x8] sm:$0xff] %vm311_vm0, %v1067_v56 }
  0xed   : > { %1164 = vst.msk [vmem:[#allocation2 + $0x108] sm:$0xff] %vm311_vm0, %v1099_v58 }
  0xee   : > { %v1964_v62 = vpop.f32.mrb[4].mxu0 }
  0xef   : > { %v1072_v1 = vadd.f32 %v1964_v62, %v382_v59  ;;  %v1996_v2 = vpop.f32.mrb[4].mxu1  ;;  %v827_v3 = vpop.f32.mrb[5].mxu0 }
  0xf0   : > { %v1200_v6 = vld [vmem:[#allocation2 + $0x10] sm:$0xff]  ;;  %v1104_v7 = vadd.f32 %v1996_v2, %v414_v60  ;;  %v1070_v8 = vadd.f32 %v827_v3, %v380_v61  ;;  %v955_v9 = vpop.f32.mrb[5].mxu1  ;;  %v1965_v10 = vpop.f32.mrb[6].mxu0 }
  0xf1   : > { %v1858_v12 = vpack.c.bf16 %v1200_v6, %v1200_v6  ;;  %v1232_v13 = vld [vmem:[#allocation2 + $0x110] sm:$0xff]  ;;  %v1198_v14 = vld [vmem:[#allocation2] sm:$0xff]  ;;  %1137 = vst.msk [vmem:[#allocation2 + $0x30] sm:$0xff] %vm311_vm0, %v1072_v1  ;;  %v1102_v15 = vadd.f32 %v955_v9, %v412_v63  ;;  %v1073_v16 = vadd.f32 %v1965_v10, %v383_v0  ;;  %v1997_v17 = vpop.f32.mrb[6].mxu1  ;;  %v830_v18 = vpop.f32.mrb[7].mxu0 }
  0xf2   : > { %v1890_v19 = vpack.c.bf16 %v1232_v13, %v1232_v13  ;;  %v1856_v20 = vpack.c.bf16 %v1198_v14, %v1198_v14  ;;  %v1230_v21 = vld [vmem:[#allocation2 + $0x100] sm:$0xff]  ;;  %v1201_v22 = vld [vmem:[#allocation2 + $0x18] sm:$0xff]  ;;  %1169 = vst.msk [vmem:[#allocation2 + $0x130] sm:$0xff] %vm311_vm0, %v1104_v7  ;;  %1135 = vst.msk [vmem:[#allocation2 + $0x20] sm:$0xff] %vm311_vm0, %v1070_v8  ;;  %v1105_v23 = vadd.f32 %v1997_v17, %v415_v4  ;;  %v958_v25 = vpop.f32.mrb[7].mxu1 }
  0xf3   : > { %v1071_v24 = vadd.f32 %v830_v18, %v381_v5  ;;  %1521 = vst.msk [vmem:[%s2380_s28 + $0x8] sm:$0xf] %vm1518_vm2, %v1858_v12  ;;  %v1888_v26 = vpack.c.bf16 %v1230_v21, %v1230_v21  ;;  %v1859_v27 = vpack.c.bf16 %v1201_v22, %v1201_v22  ;;  %v1233_v28 = vld [vmem:[#allocation2 + $0x118] sm:$0xff]  ;;  %v1199_v29 = vld [vmem:[#allocation2 + $0x8] sm:$0xff]  ;;  %v1103_v30 = vadd.f32 %v958_v25, %v413_v11  ;;  %v390_v10 = vld [vmem:[#allocation2 + $0x70] sm:$0xff] }
  0xf4   : > { %1167 = vst.msk [vmem:[#allocation2 + $0x120] sm:$0xff] %vm311_vm0, %v1102_v15  ;;  %1138 = vst.msk [vmem:[#allocation2 + $0x38] sm:$0xff] %vm311_vm0, %v1073_v16  ;;  %v1891_v31 = vpack.c.bf16 %v1233_v28, %v1233_v28  ;;  %v1857_v32 = vpack.c.bf16 %v1199_v29, %v1199_v29  ;;  %v1231_v33 = vld [vmem:[#allocation2 + $0x108] sm:$0xff]  ;;  %v422_v12 = vld [vmem:[#allocation2 + $0x170] sm:$0xff] }
  0xf5   : > { %1553 = vst.msk [vmem:[%s2380_s28 + $0x88] sm:$0xf] %vm1518_vm2, %v1890_v19  ;;  %1519 = vst.msk [vmem:[%s2380_s28] sm:$0xf] %vm1518_vm2, %v1856_v20  ;;  %v1889_v35 = vpack.c.bf16 %v1231_v33, %v1231_v33  ;;  %v388_v13 = vld [vmem:[#allocation2 + $0x60] sm:$0xff]  ;;  %v391_v16 = vld [vmem:[#allocation2 + $0x78] sm:$0xff] }
  0xf6   : > { %1170 = vst.msk [vmem:[#allocation2 + $0x138] sm:$0xff] %vm311_vm0, %v1105_v23  ;;  %1136 = vst.msk [vmem:[#allocation2 + $0x28] sm:$0xff] %vm311_vm0, %v1071_v24  ;;  %v1968_v38 = vpop.f32.mrb[8].mxu0  ;;  %v420_v15 = vld [vmem:[#allocation2 + $0x160] sm:$0xff]  ;;  %v423_v20 = vld [vmem:[#allocation2 + $0x178] sm:$0xff] }
  0xf7   : > { %1551 = vst.msk [vmem:[%s2380_s28 + $0x80] sm:$0xf] %vm1518_vm2, %v1888_v26  ;;  %1522 = vst.msk [vmem:[%s2380_s28 + $0xc] sm:$0xf] %vm1518_vm2, %v1859_v27  ;;  %v1076_v41 = vadd.f32 %v1968_v38, %v386_v34  ;;  %v2000_v42 = vpop.f32.mrb[8].mxu1  ;;  %v843_v43 = vpop.f32.mrb[9].mxu0 }
  0xf8   : > { %1168 = vst.msk [vmem:[#allocation2 + $0x128] sm:$0xff] %vm311_vm0, %v1103_v30  ;;  %v1204_v46 = vld [vmem:[#allocation2 + $0x30] sm:$0xff]  ;;  %v1108_v47 = vadd.f32 %v2000_v42, %v418_v36  ;;  %v1074_v48 = vadd.f32 %v843_v43, %v384_v37  ;;  %v971_v49 = vpop.f32.mrb[9].mxu1  ;;  %v1969_v50 = vpop.f32.mrb[10].mxu0  ;;  %v389_v21 = vld [vmem:[#allocation2 + $0x68] sm:$0xff] }
  0xf9   : > { %1554 = vst.msk [vmem:[%s2380_s28 + $0x8c] sm:$0xf] %vm1518_vm2, %v1891_v31  ;;  %1520 = vst.msk [vmem:[%s2380_s28 + $0x4] sm:$0xf] %vm1518_vm2, %v1857_v32  ;;  %v1862_v52 = vpack.c.bf16 %v1204_v46, %v1204_v46  ;;  %v1236_v53 = vld [vmem:[#allocation2 + $0x130] sm:$0xff]  ;;  %v1202_v54 = vld [vmem:[#allocation2 + $0x20] sm:$0xff]  ;;  %v1106_v55 = vadd.f32 %v971_v49, %v416_v39  ;;  %v1077_v56 = vadd.f32 %v1969_v50, %v387_v40 }
  0xfa   : > { %1552 = vst.msk [vmem:[%s2380_s28 + $0x84] sm:$0xf] %vm1518_vm2, %v1889_v35  ;;  %v2001_v57 = vpop.f32.mrb[10].mxu1  ;;  %v846_v58 = vpop.f32.mrb[11].mxu0  ;;  %v1894_v59 = vpack.c.bf16 %v1236_v53, %v1236_v53  ;;  %v1860_v60 = vpack.c.bf16 %v1202_v54, %v1202_v54  ;;  %v421_v27 = vld [vmem:[#allocation2 + $0x168] sm:$0xff]  ;;  %v394_v50 = vld [vmem:[#allocation2 + $0x90] sm:$0xff] }
  0xfb   : > { %1141 = vst.msk [vmem:[#allocation2 + $0x50] sm:$0xff] %vm311_vm0, %v1076_v41  ;;  %v1234_v61 = vld [vmem:[#allocation2 + $0x120] sm:$0xff]  ;;  %v1205_v62 = vld [vmem:[#allocation2 + $0x38] sm:$0xff]  ;;  %1173 = vst.msk [vmem:[#allocation2 + $0x150] sm:$0xff] %vm311_vm0, %v1108_v47  ;;  %v1109_v63 = vadd.f32 %v2001_v57, %v419_v44  ;;  %v1075_v0 = vadd.f32 %v846_v58, %v385_v45  ;;  %v974_v1 = vpop.f32.mrb[11].mxu1 }
  0xfc   : > { %1139 = vst.msk [vmem:[#allocation2 + $0x40] sm:$0xff] %vm311_vm0, %v1074_v48  ;;  %v1892_v2 = vpack.c.bf16 %v1234_v61, %v1234_v61  ;;  %v1863_v3 = vpack.c.bf16 %v1205_v62, %v1205_v62  ;;  %1171 = vst.msk [vmem:[#allocation2 + $0x140] sm:$0xff] %vm311_vm0, %v1106_v55  ;;  %v1107_v6 = vadd.f32 %v974_v1, %v417_v51  ;;  %v392_v53 = vld [vmem:[#allocation2 + $0x80] sm:$0xff]  ;;  %v393_v61 = vld [vmem:[#allocation2 + $0x88] sm:$0xff] }
  0xfd   : > { %1525 = vst.msk [vmem:[%s2380_s28 + $0x18] sm:$0xf] %vm1518_vm2, %v1862_v52  ;;  %v1237_v4 = vld [vmem:[#allocation2 + $0x138] sm:$0xff]  ;;  %v1203_v5 = vld [vmem:[#allocation2 + $0x28] sm:$0xff]  ;;  %1557 = vst.msk [vmem:[%s2380_s28 + $0x98] sm:$0xf] %vm1518_vm2, %v1894_v59 }
  0xfe   : > { %1142 = vst.msk [vmem:[#allocation2 + $0x58] sm:$0xff] %vm311_vm0, %v1077_v56  ;;  %v1895_v7 = vpack.c.bf16 %v1237_v4, %v1237_v4  ;;  %v1861_v8 = vpack.c.bf16 %v1203_v5, %v1203_v5  ;;  %1174 = vst.msk [vmem:[#allocation2 + $0x158] sm:$0xff] %vm311_vm0, %v1109_v63  ;;  %v1972_v14 = vpop.f32.mrb[12].mxu0  ;;  %v426_v52 = vld [vmem:[#allocation2 + $0x190] sm:$0xff]  ;;  %v424_v55 = vld [vmem:[#allocation2 + $0x180] sm:$0xff] }
  0xff   : > { %1523 = vst.msk [vmem:[%s2380_s28 + $0x10] sm:$0xf] %vm1518_vm2, %v1860_v60  ;;  %v1235_v9 = vld [vmem:[#allocation2 + $0x128] sm:$0xff]  ;;  %1555 = vst.msk [vmem:[%s2380_s28 + $0x90] sm:$0xf] %vm1518_vm2, %v1892_v2  ;;  %v1080_v17 = vadd.f32 %v1972_v14, %v390_v10  ;;  %v2004_v18 = vpop.f32.mrb[12].mxu1 }
 0x100   : > { %1140 = vst.msk [vmem:[#allocation2 + $0x48] sm:$0xff] %vm311_vm0, %v1075_v0  ;;  %v1893_v11 = vpack.c.bf16 %v1235_v9, %v1235_v9  ;;  %1172 = vst.msk [vmem:[#allocation2 + $0x148] sm:$0xff] %vm311_vm0, %v1107_v6  ;;  %v859_v19 = vpop.f32.mrb[13].mxu0  ;;  %v1112_v23 = vadd.f32 %v2004_v18, %v422_v12  ;;  %v987_v25 = vpop.f32.mrb[13].mxu1  ;;  %v395_v56 = vld [vmem:[#allocation2 + $0x98] sm:$0xff] }
 0x101   : > { %1526 = vst.msk [vmem:[%s2380_s28 + $0x1c] sm:$0xf] %vm1518_vm2, %v1863_v3  ;;  %1558 = vst.msk [vmem:[%s2380_s28 + $0x9c] sm:$0xf] %vm1518_vm2, %v1895_v7  ;;  %v1078_v24 = vadd.f32 %v859_v19, %v388_v13  ;;  %v1973_v26 = vpop.f32.mrb[14].mxu0  ;;  %v1110_v31 = vadd.f32 %v987_v25, %v420_v15  ;;  %v2005_v33 = vpop.f32.mrb[14].mxu1 }
 0x102   : > { %1524 = vst.msk [vmem:[%s2380_s28 + $0x14] sm:$0xf] %vm1518_vm2, %v1861_v8  ;;  %1556 = vst.msk [vmem:[%s2380_s28 + $0x94] sm:$0xf] %vm1518_vm2, %v1893_v11  ;;  %v1208_v22 = vld [vmem:[#allocation2 + $0x50] sm:$0xff]  ;;  %v1081_v32 = vadd.f32 %v1973_v26, %v391_v16  ;;  %v862_v34 = vpop.f32.mrb[15].mxu0  ;;  %v1113_v39 = vadd.f32 %v2005_v33, %v423_v20 }
 0x103   : > { %v1866_v28 = vpack.c.bf16 %v1208_v22, %v1208_v22  ;;  %v1240_v29 = vld [vmem:[#allocation2 + $0x150] sm:$0xff]  ;;  %v1206_v30 = vld [vmem:[#allocation2 + $0x40] sm:$0xff]  ;;  %1145 = vst.msk [vmem:[#allocation2 + $0x70] sm:$0xff] %vm311_vm0, %v1080_v17  ;;  %1177 = vst.msk [vmem:[#allocation2 + $0x170] sm:$0xff] %vm311_vm0, %v1112_v23  ;;  %v1079_v40 = vadd.f32 %v862_v34, %v389_v21  ;;  %v990_v41 = vpop.f32.mrb[15].mxu1 }
 0x104   : > { %v1898_v35 = vpack.c.bf16 %v1240_v29, %v1240_v29  ;;  %v1864_v36 = vpack.c.bf16 %v1206_v30, %v1206_v30  ;;  %v1238_v37 = vld [vmem:[#allocation2 + $0x140] sm:$0xff]  ;;  %1143 = vst.msk [vmem:[#allocation2 + $0x60] sm:$0xff] %vm311_vm0, %v1078_v24  ;;  %1175 = vst.msk [vmem:[#allocation2 + $0x160] sm:$0xff] %vm311_vm0, %v1110_v31  ;;  %v1111_v46 = vadd.f32 %v990_v41, %v421_v27  ;;  %v427_v60 = vld [vmem:[#allocation2 + $0x198] sm:$0xff] }
 0x105   : > { %v1209_v38 = vld [vmem:[#allocation2 + $0x58] sm:$0xff]  ;;  %1529 = vst.msk [vmem:[%s2380_s28 + $0x28] sm:$0xf] %vm1518_vm2, %v1866_v28  ;;  %v1896_v42 = vpack.c.bf16 %v1238_v37, %v1238_v37  ;;  %v425_v3 = vld [vmem:[#allocation2 + $0x188] sm:$0xff]  ;;  %v398_v26 = vld [vmem:[#allocation2 + $0xb0] sm:$0xff] }
 0x106   : > { %v1867_v43 = vpack.c.bf16 %v1209_v38, %v1209_v38  ;;  %v1241_v44 = vld [vmem:[#allocation2 + $0x158] sm:$0xff]  ;;  %1146 = vst.msk [vmem:[#allocation2 + $0x78] sm:$0xff] %vm311_vm0, %v1081_v32  ;;  %1178 = vst.msk [vmem:[#allocation2 + $0x178] sm:$0xff] %vm311_vm0, %v1113_v39  ;;  %v1976_v54 = vpop.f32.mrb[16].mxu0  ;;  %v430_v28 = vld [vmem:[#allocation2 + $0x1b0] sm:$0xff] }
 0x107   : > { %v1207_v45 = vld [vmem:[#allocation2 + $0x48] sm:$0xff]  ;;  %1561 = vst.msk [vmem:[%s2380_s28 + $0xa8] sm:$0xf] %vm1518_vm2, %v1898_v35  ;;  %1527 = vst.msk [vmem:[%s2380_s28 + $0x20] sm:$0xf] %vm1518_vm2, %v1864_v36  ;;  %v1899_v47 = vpack.c.bf16 %v1241_v44, %v1241_v44  ;;  %v1084_v57 = vadd.f32 %v1976_v54, %v394_v50  ;;  %v2008_v58 = vpop.f32.mrb[16].mxu1 }
 0x108   : > { %v1865_v48 = vpack.c.bf16 %v1207_v45, %v1207_v45  ;;  %v1239_v49 = vld [vmem:[#allocation2 + $0x148] sm:$0xff]  ;;  %1144 = vst.msk [vmem:[#allocation2 + $0x68] sm:$0xff] %vm311_vm0, %v1079_v40  ;;  %1176 = vst.msk [vmem:[#allocation2 + $0x168] sm:$0xff] %vm311_vm0, %v1111_v46  ;;  %v875_v59 = vpop.f32.mrb[17].mxu0  ;;  %v1116_v63 = vadd.f32 %v2008_v58, %v426_v52  ;;  %v1003_v1 = vpop.f32.mrb[17].mxu1  ;;  %v396_v29 = vld [vmem:[#allocation2 + $0xa0] sm:$0xff] }
 0x109   : > { %1559 = vst.msk [vmem:[%s2380_s28 + $0xa0] sm:$0xf] %vm1518_vm2, %v1896_v42  ;;  %1530 = vst.msk [vmem:[%s2380_s28 + $0x2c] sm:$0xf] %vm1518_vm2, %v1867_v43  ;;  %v1897_v51 = vpack.c.bf16 %v1239_v49, %v1239_v49  ;;  %v1082_v0 = vadd.f32 %v875_v59, %v392_v53  ;;  %v1977_v2 = vpop.f32.mrb[18].mxu0  ;;  %v1114_v7 = vadd.f32 %v1003_v1, %v424_v55  ;;  %v2009_v9 = vpop.f32.mrb[18].mxu1 }
 0x10a   : > { %1562 = vst.msk [vmem:[%s2380_s28 + $0xac] sm:$0xf] %vm1518_vm2, %v1899_v47  ;;  %1528 = vst.msk [vmem:[%s2380_s28 + $0x24] sm:$0xf] %vm1518_vm2, %v1865_v48  ;;  %v1212_v62 = vld [vmem:[#allocation2 + $0x70] sm:$0xff]  ;;  %v1085_v8 = vadd.f32 %v1977_v2, %v395_v56  ;;  %v878_v10 = vpop.f32.mrb[19].mxu0  ;;  %v1117_v15 = vadd.f32 %v2009_v9, %v427_v60 }
 0x10b   : > { %1560 = vst.msk [vmem:[%s2380_s28 + $0xa4] sm:$0xf] %vm1518_vm2, %v1897_v51  ;;  %v1870_v4 = vpack.c.bf16 %v1212_v62, %v1212_v62  ;;  %v1244_v5 = vld [vmem:[#allocation2 + $0x170] sm:$0xff]  ;;  %v1210_v6 = vld [vmem:[#allocation2 + $0x60] sm:$0xff]  ;;  %v1083_v16 = vadd.f32 %v878_v10, %v393_v61  ;;  %v1006_v17 = vpop.f32.mrb[19].mxu1  ;;  %v399_v32 = vld [vmem:[#allocation2 + $0xb8] sm:$0xff] }
 0x10c   : > { %1149 = vst.msk [vmem:[#allocation2 + $0x90] sm:$0xff] %vm311_vm0, %v1084_v57  ;;  %v1902_v11 = vpack.c.bf16 %v1244_v5, %v1244_v5  ;;  %v1868_v12 = vpack.c.bf16 %v1210_v6, %v1210_v6  ;;  %v1242_v13 = vld [vmem:[#allocation2 + $0x160] sm:$0xff]  ;;  %1181 = vst.msk [vmem:[#allocation2 + $0x190] sm:$0xff] %vm311_vm0, %v1116_v63  ;;  %v1115_v22 = vadd.f32 %v1006_v17, %v425_v3  ;;  %v431_v36 = vld [vmem:[#allocation2 + $0x1b8] sm:$0xff] }
 0x10d   : > { %v1213_v14 = vld [vmem:[#allocation2 + $0x78] sm:$0xff]  ;;  %1147 = vst.msk [vmem:[#allocation2 + $0x80] sm:$0xff] %vm311_vm0, %v1082_v0  ;;  %v1900_v18 = vpack.c.bf16 %v1242_v13, %v1242_v13  ;;  %1179 = vst.msk [vmem:[#allocation2 + $0x180] sm:$0xff] %vm311_vm0, %v1114_v7  ;;  %v428_v31 = vld [vmem:[#allocation2 + $0x1a0] sm:$0xff] }
 0x10e   : > { %1533 = vst.msk [vmem:[%s2380_s28 + $0x38] sm:$0xf] %vm1518_vm2, %v1870_v4  ;;  %v1871_v19 = vpack.c.bf16 %v1213_v14, %v1213_v14  ;;  %v1245_v20 = vld [vmem:[#allocation2 + $0x178] sm:$0xff]  ;;  %1565 = vst.msk [vmem:[%s2380_s28 + $0xb8] sm:$0xf] %vm1518_vm2, %v1902_v11  ;;  %v1980_v30 = vpop.f32.mrb[20].mxu0 }
 0x10f   : > { %v1211_v21 = vld [vmem:[#allocation2 + $0x68] sm:$0xff]  ;;  %1150 = vst.msk [vmem:[#allocation2 + $0x98] sm:$0xff] %vm311_vm0, %v1085_v8  ;;  %v1903_v23 = vpack.c.bf16 %v1245_v20, %v1245_v20  ;;  %1182 = vst.msk [vmem:[#allocation2 + $0x198] sm:$0xff] %vm311_vm0, %v1117_v15  ;;  %v1088_v33 = vadd.f32 %v1980_v30, %v398_v26  ;;  %v2012_v34 = vpop.f32.mrb[20].mxu1  ;;  %v891_v35 = vpop.f32.mrb[21].mxu0  ;;  %v402_v2 = vld [vmem:[#allocation2 + $0xd0] sm:$0xff] }
 0x110   : > { %1531 = vst.msk [vmem:[%s2380_s28 + $0x30] sm:$0xf] %vm1518_vm2, %v1868_v12  ;;  %v1869_v24 = vpack.c.bf16 %v1211_v21, %v1211_v21  ;;  %v1243_v25 = vld [vmem:[#allocation2 + $0x168] sm:$0xff]  ;;  %1563 = vst.msk [vmem:[%s2380_s28 + $0xb0] sm:$0xf] %vm1518_vm2, %v1900_v18  ;;  %v1120_v39 = vadd.f32 %v2012_v34, %v430_v28  ;;  %v1086_v40 = vadd.f32 %v891_v35, %v396_v29  ;;  %v1019_v41 = vpop.f32.mrb[21].mxu1 }
 0x111   : > { %1148 = vst.msk [vmem:[#allocation2 + $0x88] sm:$0xff] %vm311_vm0, %v1083_v16  ;;  %v1901_v27 = vpack.c.bf16 %v1243_v25, %v1243_v25  ;;  %1180 = vst.msk [vmem:[#allocation2 + $0x188] sm:$0xff] %vm311_vm0, %v1115_v22  ;;  %v397_v37 = vld [vmem:[#allocation2 + $0xa8] sm:$0xff]  ;;  %v1981_v42 = vpop.f32.mrb[22].mxu0  ;;  %v1118_v47 = vadd.f32 %v1019_v41, %v428_v31  ;;  %v2013_v49 = vpop.f32.mrb[22].mxu1  ;;  %v434_v4 = vld [vmem:[#allocation2 + $0x1d0] sm:$0xff] }
 0x112   : > { %1534 = vst.msk [vmem:[%s2380_s28 + $0x3c] sm:$0xf] %vm1518_vm2, %v1871_v19  ;;  %1566 = vst.msk [vmem:[%s2380_s28 + $0xbc] sm:$0xf] %vm1518_vm2, %v1903_v23  ;;  %v429_v43 = vld [vmem:[#allocation2 + $0x1a8] sm:$0xff]  ;;  %v1089_v48 = vadd.f32 %v1981_v42, %v399_v32  ;;  %v894_v50 = vpop.f32.mrb[23].mxu0  ;;  %v1121_v55 = vadd.f32 %v2013_v49, %v431_v36 }
 0x113   : > { %1532 = vst.msk [vmem:[%s2380_s28 + $0x34] sm:$0xf] %vm1518_vm2, %v1869_v24  ;;  %1564 = vst.msk [vmem:[%s2380_s28 + $0xb4] sm:$0xf] %vm1518_vm2, %v1901_v27  ;;  %v1216_v38 = vld [vmem:[#allocation2 + $0x90] sm:$0xff]  ;;  %v1087_v56 = vadd.f32 %v894_v50, %v397_v37  ;;  %v1022_v57 = vpop.f32.mrb[23].mxu1 }
 0x114   : > { %v1874_v44 = vpack.c.bf16 %v1216_v38, %v1216_v38  ;;  %v1248_v45 = vld [vmem:[#allocation2 + $0x190] sm:$0xff]  ;;  %v1214_v46 = vld [vmem:[#allocation2 + $0x80] sm:$0xff]  ;;  %1153 = vst.msk [vmem:[#allocation2 + $0xb0] sm:$0xff] %vm311_vm0, %v1088_v33  ;;  %1185 = vst.msk [vmem:[#allocation2 + $0x1b0] sm:$0xff] %vm311_vm0, %v1120_v39  ;;  %v1119_v62 = vadd.f32 %v1022_v57, %v429_v43 }
 0x115   : > { %v1906_v51 = vpack.c.bf16 %v1248_v45, %v1248_v45  ;;  %v1872_v52 = vpack.c.bf16 %v1214_v46, %v1214_v46  ;;  %v1246_v53 = vld [vmem:[#allocation2 + $0x180] sm:$0xff]  ;;  %1151 = vst.msk [vmem:[#allocation2 + $0xa0] sm:$0xff] %vm311_vm0, %v1086_v40  ;;  %1183 = vst.msk [vmem:[#allocation2 + $0x1a0] sm:$0xff] %vm311_vm0, %v1118_v47  ;;  %v403_v8 = vld [vmem:[#allocation2 + $0xd8] sm:$0xff] }
 0x116   : > { %v1217_v54 = vld [vmem:[#allocation2 + $0x98] sm:$0xff]  ;;  %1537 = vst.msk [vmem:[%s2380_s28 + $0x48] sm:$0xf] %vm1518_vm2, %v1874_v44  ;;  %v1904_v58 = vpack.c.bf16 %v1246_v53, %v1246_v53  ;;  %v400_v5 = vld [vmem:[#allocation2 + $0xc0] sm:$0xff]  ;;  %v1984_v6 = vpop.f32.mrb[24].mxu0  ;;  %v401_v13 = vld [vmem:[#allocation2 + $0xc8] sm:$0xff] }
 0x117   : > { %v1875_v59 = vpack.c.bf16 %v1217_v54, %v1217_v54  ;;  %v1249_v60 = vld [vmem:[#allocation2 + $0x198] sm:$0xff]  ;;  %1154 = vst.msk [vmem:[#allocation2 + $0xb8] sm:$0xff] %vm311_vm0, %v1089_v48  ;;  %1186 = vst.msk [vmem:[#allocation2 + $0x1b8] sm:$0xff] %vm311_vm0, %v1121_v55  ;;  %v432_v7 = vld [vmem:[#allocation2 + $0x1c0] sm:$0xff]  ;;  %v1092_v9 = vadd.f32 %v1984_v6, %v402_v2  ;;  %v2016_v10 = vpop.f32.mrb[24].mxu1  ;;  %v907_v11 = vpop.f32.mrb[25].mxu0 }
 0x118   : > { %v1215_v61 = vld [vmem:[#allocation2 + $0x88] sm:$0xff]  ;;  %1569 = vst.msk [vmem:[%s2380_s28 + $0xc8] sm:$0xf] %vm1518_vm2, %v1906_v51  ;;  %1535 = vst.msk [vmem:[%s2380_s28 + $0x40] sm:$0xf] %vm1518_vm2, %v1872_v52  ;;  %v1907_v63 = vpack.c.bf16 %v1249_v60, %v1249_v60  ;;  %v435_v12 = vld [vmem:[#allocation2 + $0x1d8] sm:$0xff]  ;;  %v1124_v15 = vadd.f32 %v2016_v10, %v434_v4  ;;  %v1090_v16 = vadd.f32 %v907_v11, %v400_v5 }
 0x119   : > { %v1873_v0 = vpack.c.bf16 %v1215_v61, %v1215_v61  ;;  %v1247_v1 = vld [vmem:[#allocation2 + $0x188] sm:$0xff]  ;;  %1152 = vst.msk [vmem:[#allocation2 + $0xa8] sm:$0xff] %vm311_vm0, %v1087_v56  ;;  %1184 = vst.msk [vmem:[#allocation2 + $0x1a8] sm:$0xff] %vm311_vm0, %v1119_v62  ;;  %v1035_v17 = vpop.f32.mrb[25].mxu1  ;;  %v1985_v18 = vpop.f32.mrb[26].mxu0  ;;  %v406_v42 = vld [vmem:[#allocation2 + $0xf0] sm:$0xff] }
 0x11a   : > { %1567 = vst.msk [vmem:[%s2380_s28 + $0xc0] sm:$0xf] %vm1518_vm2, %v1904_v58  ;;  %1538 = vst.msk [vmem:[%s2380_s28 + $0x4c] sm:$0xf] %vm1518_vm2, %v1875_v59  ;;  %v1905_v3 = vpack.c.bf16 %v1247_v1, %v1247_v1  ;;  %v433_v19 = vld [vmem:[#allocation2 + $0x1c8] sm:$0xff]  ;;  %v1122_v23 = vadd.f32 %v1035_v17, %v432_v7  ;;  %v1093_v24 = vadd.f32 %v1985_v18, %v403_v8  ;;  %v2017_v25 = vpop.f32.mrb[26].mxu1 }
 0x11b   : > { %1570 = vst.msk [vmem:[%s2380_s28 + $0xcc] sm:$0xf] %vm1518_vm2, %v1907_v63  ;;  %1536 = vst.msk [vmem:[%s2380_s28 + $0x44] sm:$0xf] %vm1518_vm2, %v1873_v0  ;;  %v1220_v14 = vld [vmem:[#allocation2 + $0xb0] sm:$0xff]  ;;  %v910_v26 = vpop.f32.mrb[27].mxu0  ;;  %v1125_v31 = vadd.f32 %v2017_v25, %v435_v12 }
 0x11c   : > { %1568 = vst.msk [vmem:[%s2380_s28 + $0xc4] sm:$0xf] %vm1518_vm2, %v1905_v3  ;;  %v1878_v20 = vpack.c.bf16 %v1220_v14, %v1220_v14  ;;  %v1252_v21 = vld [vmem:[#allocation2 + $0x1b0] sm:$0xff]  ;;  %v1218_v22 = vld [vmem:[#allocation2 + $0xa0] sm:$0xff]  ;;  %v1091_v32 = vadd.f32 %v910_v26, %v401_v13  ;;  %v1038_v33 = vpop.f32.mrb[27].mxu1  ;;  %v407_v48 = vld [vmem:[#allocation2 + $0xf8] sm:$0xff] }
 0x11d   : > { %1157 = vst.msk [vmem:[#allocation2 + $0xd0] sm:$0xff] %vm311_vm0, %v1092_v9  ;;  %v1910_v27 = vpack.c.bf16 %v1252_v21, %v1252_v21  ;;  %v1876_v28 = vpack.c.bf16 %v1218_v22, %v1218_v22  ;;  %v1250_v29 = vld [vmem:[#allocation2 + $0x1a0] sm:$0xff]  ;;  %1189 = vst.msk [vmem:[#allocation2 + $0x1d0] sm:$0xff] %vm311_vm0, %v1124_v15  ;;  %v1123_v38 = vadd.f32 %v1038_v33, %v433_v19  ;;  %v438_v44 = vld [vmem:[#allocation2 + $0x1f0] sm:$0xff] }
 0x11e   : > { %v1221_v30 = vld [vmem:[#allocation2 + $0xb8] sm:$0xff]  ;;  %1155 = vst.msk [vmem:[#allocation2 + $0xc0] sm:$0xff] %vm311_vm0, %v1090_v16  ;;  %v1908_v34 = vpack.c.bf16 %v1250_v29, %v1250_v29  ;;  %1187 = vst.msk [vmem:[#allocation2 + $0x1c0] sm:$0xff] %vm311_vm0, %v1122_v23  ;;  %v404_v45 = vld [vmem:[#allocation2 + $0xe0] sm:$0xff]  ;;  %v1988_v46 = vpop.f32.mrb[28].mxu0 }
 0x11f   : > { %1541 = vst.msk [vmem:[%s2380_s28 + $0x58] sm:$0xf] %vm1518_vm2, %v1878_v20  ;;  %v1879_v35 = vpack.c.bf16 %v1221_v30, %v1221_v30  ;;  %v1253_v36 = vld [vmem:[#allocation2 + $0x1b8] sm:$0xff]  ;;  %1573 = vst.msk [vmem:[%s2380_s28 + $0xd8] sm:$0xf] %vm1518_vm2, %v1910_v27  ;;  %v436_v47 = vld [vmem:[#allocation2 + $0x1e0] sm:$0xff]  ;;  %v1096_v49 = vadd.f32 %v1988_v46, %v406_v42 }
 0x120   : > { %v1219_v37 = vld [vmem:[#allocation2 + $0xa8] sm:$0xff]  ;;  %1158 = vst.msk [vmem:[#allocation2 + $0xd8] sm:$0xff] %vm311_vm0, %v1093_v24  ;;  %v1911_v39 = vpack.c.bf16 %v1253_v36, %v1253_v36  ;;  %1190 = vst.msk [vmem:[#allocation2 + $0x1d8] sm:$0xff] %vm311_vm0, %v1125_v31  ;;  %v2020_v50 = vpop.f32.mrb[28].mxu1  ;;  %v923_v51 = vpop.f32.mrb[29].mxu0  ;;  %v439_v52 = vld [vmem:[#allocation2 + $0x1f8] sm:$0xff] }
 0x121   : > { %1539 = vst.msk [vmem:[%s2380_s28 + $0x50] sm:$0xf] %vm1518_vm2, %v1876_v28  ;;  %v1877_v40 = vpack.c.bf16 %v1219_v37, %v1219_v37  ;;  %v1251_v41 = vld [vmem:[#allocation2 + $0x1a8] sm:$0xff]  ;;  %1571 = vst.msk [vmem:[%s2380_s28 + $0xd0] sm:$0xf] %vm1518_vm2, %v1908_v34  ;;  %v1128_v55 = vadd.f32 %v2020_v50, %v438_v44  ;;  %v1094_v56 = vadd.f32 %v923_v51, %v404_v45  ;;  %v1051_v57 = vpop.f32.mrb[29].mxu1 }
 0x122   : > { %1156 = vst.msk [vmem:[#allocation2 + $0xc8] sm:$0xff] %vm311_vm0, %v1091_v32  ;;  %v1909_v43 = vpack.c.bf16 %v1251_v41, %v1251_v41  ;;  %1188 = vst.msk [vmem:[#allocation2 + $0x1c8] sm:$0xff] %vm311_vm0, %v1123_v38  ;;  %v405_v53 = vld [vmem:[#allocation2 + $0xe8] sm:$0xff]  ;;  %v1989_v58 = vpop.f32.mrb[30].mxu0  ;;  %v1126_v63 = vadd.f32 %v1051_v57, %v436_v47  ;;  %v2021_v1 = vpop.f32.mrb[30].mxu1 }
 0x123   : > { %1542 = vst.msk [vmem:[%s2380_s28 + $0x5c] sm:$0xf] %vm1518_vm2, %v1879_v35  ;;  %1574 = vst.msk [vmem:[%s2380_s28 + $0xdc] sm:$0xf] %vm1518_vm2, %v1911_v39  ;;  %v437_v59 = vld [vmem:[#allocation2 + $0x1e8] sm:$0xff]  ;;  %v1097_v0 = vadd.f32 %v1989_v58, %v407_v48  ;;  %v926_v2 = vpop.f32.mrb[31].mxu0  ;;  %v1129_v7 = vadd.f32 %v2021_v1, %v439_v52 }
 0x124   : > { %1540 = vst.msk [vmem:[%s2380_s28 + $0x54] sm:$0xf] %vm1518_vm2, %v1877_v40  ;;  %1572 = vst.msk [vmem:[%s2380_s28 + $0xd4] sm:$0xf] %vm1518_vm2, %v1909_v43  ;;  %v1224_v54 = vld [vmem:[#allocation2 + $0xd0] sm:$0xff]  ;;  %v1095_v8 = vadd.f32 %v926_v2, %v405_v53  ;;  %v1054_v9 = vpop.f32.mrb[31].mxu1 }
 0x125   : > { %v1882_v60 = vpack.c.bf16 %v1224_v54, %v1224_v54  ;;  %v1256_v61 = vld [vmem:[#allocation2 + $0x1d0] sm:$0xff]  ;;  %v1222_v62 = vld [vmem:[#allocation2 + $0xc0] sm:$0xff]  ;;  %1161 = vst.msk [vmem:[#allocation2 + $0xf0] sm:$0xff] %vm311_vm0, %v1096_v49  ;;  %1193 = vst.msk [vmem:[#allocation2 + $0x1f0] sm:$0xff] %vm311_vm0, %v1128_v55  ;;  %v1127_v14 = vadd.f32 %v1054_v9, %v437_v59 }
 0x126   : > { %v1914_v3 = vpack.c.bf16 %v1256_v61, %v1256_v61  ;;  %v1880_v4 = vpack.c.bf16 %v1222_v62, %v1222_v62  ;;  %v1254_v5 = vld [vmem:[#allocation2 + $0x1c0] sm:$0xff]  ;;  %1159 = vst.msk [vmem:[#allocation2 + $0xe0] sm:$0xff] %vm311_vm0, %v1094_v56  ;;  %1191 = vst.msk [vmem:[#allocation2 + $0x1e0] sm:$0xff] %vm311_vm0, %v1126_v63 }
 0x127   : > { %v1225_v6 = vld [vmem:[#allocation2 + $0xd8] sm:$0xff]  ;;  %1545 = vst.msk [vmem:[%s2380_s28 + $0x68] sm:$0xf] %vm1518_vm2, %v1882_v60  ;;  %v1912_v10 = vpack.c.bf16 %v1254_v5, %v1254_v5 }
 0x128   : > { %v1883_v11 = vpack.c.bf16 %v1225_v6, %v1225_v6  ;;  %v1257_v12 = vld [vmem:[#allocation2 + $0x1d8] sm:$0xff]  ;;  %1162 = vst.msk [vmem:[#allocation2 + $0xf8] sm:$0xff] %vm311_vm0, %v1097_v0  ;;  %1194 = vst.msk [vmem:[#allocation2 + $0x1f8] sm:$0xff] %vm311_vm0, %v1129_v7 }
 0x129   : > { %v1223_v13 = vld [vmem:[#allocation2 + $0xc8] sm:$0xff]  ;;  %1577 = vst.msk [vmem:[%s2380_s28 + $0xe8] sm:$0xf] %vm1518_vm2, %v1914_v3  ;;  %1543 = vst.msk [vmem:[%s2380_s28 + $0x60] sm:$0xf] %vm1518_vm2, %v1880_v4  ;;  %v1915_v15 = vpack.c.bf16 %v1257_v12, %v1257_v12 }
 0x12a   : > { %v1881_v16 = vpack.c.bf16 %v1223_v13, %v1223_v13  ;;  %v1255_v17 = vld [vmem:[#allocation2 + $0x1c8] sm:$0xff]  ;;  %1160 = vst.msk [vmem:[#allocation2 + $0xe8] sm:$0xff] %vm311_vm0, %v1095_v8  ;;  %1192 = vst.msk [vmem:[#allocation2 + $0x1e8] sm:$0xff] %vm311_vm0, %v1127_v14 }
 0x12b   : > { %1575 = vst.msk [vmem:[%s2380_s28 + $0xe0] sm:$0xf] %vm1518_vm2, %v1912_v10  ;;  %1546 = vst.msk [vmem:[%s2380_s28 + $0x6c] sm:$0xf] %vm1518_vm2, %v1883_v11  ;;  %v1913_v18 = vpack.c.bf16 %v1255_v17, %v1255_v17 }
 0x12c   : > { %1578 = vst.msk [vmem:[%s2380_s28 + $0xec] sm:$0xf] %vm1518_vm2, %v1915_v15  ;;  %1544 = vst.msk [vmem:[%s2380_s28 + $0x64] sm:$0xf] %vm1518_vm2, %v1881_v16  ;;  %v1228_v19 = vld [vmem:[#allocation2 + $0xf0] sm:$0xff] }
 0x12d   : > { %1576 = vst.msk [vmem:[%s2380_s28 + $0xe4] sm:$0xf] %vm1518_vm2, %v1913_v18  ;;  %v1886_v20 = vpack.c.bf16 %v1228_v19, %v1228_v19  ;;  %v1260_v21 = vld [vmem:[#allocation2 + $0x1f0] sm:$0xff]  ;;  %v1226_v22 = vld [vmem:[#allocation2 + $0xe0] sm:$0xff] }
 0x12e   : > { %v1918_v23 = vpack.c.bf16 %v1260_v21, %v1260_v21  ;;  %v1884_v24 = vpack.c.bf16 %v1226_v22, %v1226_v22  ;;  %v1258_v25 = vld [vmem:[#allocation2 + $0x1e0] sm:$0xff] }
 0x12f   : > { %v1229_v26 = vld [vmem:[#allocation2 + $0xf8] sm:$0xff]  ;;  %1549 = vst.msk [vmem:[%s2380_s28 + $0x78] sm:$0xf] %vm1518_vm2, %v1886_v20  ;;  %v1916_v27 = vpack.c.bf16 %v1258_v25, %v1258_v25 }
 0x130   : > { %v1887_v28 = vpack.c.bf16 %v1229_v26, %v1229_v26  ;;  %v1261_v29 = vld [vmem:[#allocation2 + $0x1f8] sm:$0xff]  ;;  %1581 = vst.msk [vmem:[%s2380_s28 + $0xf8] sm:$0xf] %vm1518_vm2, %v1918_v23  ;;  %1547 = vst.msk [vmem:[%s2380_s28 + $0x70] sm:$0xf] %vm1518_vm2, %v1884_v24 }
 0x131   : > { %v1227_v30 = vld [vmem:[#allocation2 + $0xe8] sm:$0xff]  ;;  %v1919_v31 = vpack.c.bf16 %v1261_v29, %v1261_v29  ;;  %1579 = vst.msk [vmem:[%s2380_s28 + $0xf0] sm:$0xf] %vm1518_vm2, %v1916_v27 }
 0x132   : > { %v1885_v32 = vpack.c.bf16 %v1227_v30, %v1227_v30  ;;  %v1259_v33 = vld [vmem:[#allocation2 + $0x1e8] sm:$0xff]  ;;  %1550 = vst.msk [vmem:[%s2380_s28 + $0x7c] sm:$0xf] %vm1518_vm2, %v1887_v28 }
 0x133   : > { %v1917_v34 = vpack.c.bf16 %v1259_v33, %v1259_v33  ;;  %1582 = vst.msk [vmem:[%s2380_s28 + $0xfc] sm:$0xf] %vm1518_vm2, %v1919_v31 }
 0x134   : > { %1548 = vst.msk [vmem:[%s2380_s28 + $0x74] sm:$0xf] %vm1518_vm2, %v1885_v32 }
 0x135   : > { %1580 = vst.msk [vmem:[%s2380_s28 + $0xf4] sm:$0xf] %vm1518_vm2, %v1917_v34 }
 0x136 PF: > { %s14_s17 = sadd.s32 1, %s2107_s17   ;;  %s2580_s15 = smov %s2103_s16 }
 0x137   : > { %p11_p5 = scmp.ge.s32.totalorder %s14_s17, 18   ;;  %s2581_s16 = smov %s2583_s2 }
 0x139   :  { %13 = sbr.rel (!%p11_p5) target bundleno = 2 (0x2), region = 83 }

</bundles_post_ra>
